<compile_context>
chip_gen: v5e
topology: v5e:2x2
jax: 0.10.0
libtpu: 0.0.40
codegen_flags: <defaults>
</compile_context>

<pallas_src>
import functools

import jax
import jax.numpy as jnp
from jax.experimental import pallas as pl
from jax.experimental.pallas import tpu as pltpu


def _round_up(x, m):
    return ((x + m - 1) // m) * m


def _choose_tiling(N, K, C_in, C_out, itemsize, requested,
                   budget_bytes=20 * 1024 * 1024):
    """Pick (tile_n, n_pad) so the double-buffered VMEM footprint stays well under
    the tightest per-generation budget (v7x: 64 MiB physical, 32 MiB default scoped).
    Lane padding of the channels-last tiles (C_in -> 128) is accounted for."""
    c_pad = _round_up(C_in, 128)
    co_pad = _round_up(C_out, 8)

    def est(t):
        xj = 2 * t * K * c_pad * itemsize       # double-buffered xj input blocks
        h = t * K * c_pad * 4                   # live f32 nn1 matmul result
        xb = 2 * t * c_pad * itemsize           # double-buffered x blocks
        ob = 2 * co_pad * max(t, 128) * 4       # double-buffered output blocks
        return xj + h + xb + ob

    tn_full = _round_up(N, 8)
    if tn_full <= requested and est(tn_full) <= budget_bytes:
        return tn_full, tn_full                 # single tile covering all nodes
    tn = max(128, (min(requested, tn_full) // 128) * 128)
    while tn > 128 and est(tn) > budget_bytes:
        tn //= 2
    return tn, _round_up(N, tn)


def _graphsage_kernel(xj_ref, x_ref, w1_ref, b1_ref, w2at_ref, w2bt_ref, b2_ref,
                      o_ref, *, K, tile_n, compute_dtype):
    # Block shapes:
    #   xj_ref : (1, TILE_N*K, C_in)  gathered neighbor features, n-major rows
    #   x_ref  : (1, TILE_N, C_in)    node features (channels-last)
    #   w1_ref : (C_in, C_in)         nn1 weight  [in, out]
    #   b1_ref : (1, C_in)            nn1 bias (f32)
    #   w2at   : (C_out, C_in)        nn2 weight, x half, pre-transposed
    #   w2bt   : (C_out, C_in)        nn2 weight, x_j half, pre-transposed
    #   b2_ref : (C_out, 1)           nn2 bias (f32)
    #   o_ref  : (1, C_out, TILE_N)   output tile (channels-first -> lane-dense)
    C_in = w1_ref.shape[0]

    # nn1: ONE streamed matmul over all K neighbors of the tile's nodes
    # (M = TILE_N*K keeps the MXU busy), then the K-max on the VPU/XLU.
    # bias + ReLU once after the max: relu(m + b) is monotone in m, so
    # max_k relu(m_k + b1) == relu(max_k m_k + b1) exactly.
    h = jnp.dot(xj_ref[0], w1_ref[...],
                preferred_element_type=jnp.float32)          # [TILE_N*K, C_in] f32
    m = jnp.max(h.reshape(tile_n, K, C_in), axis=1)          # [TILE_N, C_in] f32
    h_max = jnp.maximum(m + b1_ref[...], 0.0)                # f32 on the VPU

    # nn2, transposed so N sits on the lane axis:
    #   out^T = W2a^T @ x^T + W2b^T @ h_max^T + b2           -> [C_out, TILE_N]
    dn = (((1,), (1,)), ((), ()))                            # contract the C_in axes
    acc = jax.lax.dot_general(w2at_ref[...], x_ref[0], dn,
                              preferred_element_type=jnp.float32)
    acc = acc + jax.lax.dot_general(w2bt_ref[...], h_max.astype(compute_dtype), dn,
                                    preferred_element_type=jnp.float32)
    o_ref[0] = jnp.maximum(acc + b2_ref[...], 0.0).astype(o_ref.dtype)


def graphsage_pallas(xj, x_cl, w1, b1, w2at, w2bt, b2, *, K, tile_n, out_dtype):
    B, n_rows, C_in = xj.shape
    n_pad = n_rows // K
    C_out = w2at.shape[0]
    num_nt = n_pad // tile_n
    kernel = functools.partial(_graphsage_kernel, K=K, tile_n=tile_n,
                               compute_dtype=xj.dtype)
    return pl.pallas_call(
        kernel,
        out_shape=jax.ShapeDtypeStruct((B, C_out, n_pad), out_dtype),
        grid=(B, num_nt),
        in_specs=[
            # xj block: one contiguous (TILE_N*K*C_in) HBM slab per grid step.
            pl.BlockSpec((1, tile_n * K, C_in), lambda b, n: (b, n, 0)),
            pl.BlockSpec((1, tile_n, C_in), lambda b, n: (b, n, 0)),
            pl.BlockSpec((C_in, C_in), lambda b, n: (0, 0)),
            pl.BlockSpec((1, C_in), lambda b, n: (0, 0)),
            pl.BlockSpec((C_out, C_in), lambda b, n: (0, 0)),
            pl.BlockSpec((C_out, C_in), lambda b, n: (0, 0)),
            pl.BlockSpec((C_out, 1), lambda b, n: (0, 0)),
        ],
        out_specs=pl.BlockSpec((1, C_out, tile_n), lambda b, n: (b, 0, n)),
        compiler_params=pltpu.CompilerParams(
            dimension_semantics=("parallel", "parallel"),
            vmem_limit_bytes=48 * 1024 * 1024),
    )(xj, x_cl, w1, b1, w2at, w2bt, b2)


def graphsage_forward(x_nchw, edge_index, w1, b1, w2a, w2b, b2, *,
                      compute_dtype=jnp.bfloat16, out_dtype=jnp.float32,
                      tile_n=1024):
    """x_nchw: [B, C_in, N, 1], edge_index: [2, B, N, K] -> [B, C_out, N, 1]."""
    B, C_in, N, _ = x_nchw.shape
    C_out = w2a.shape[-1]
    K = edge_index.shape[-1]

    itemsize = jnp.dtype(compute_dtype).itemsize
    tn, n_pad = _choose_tiling(N, K, C_in, C_out, itemsize, tile_n)

    # Node features, channels-last, in the matmul compute dtype (bf16 by default,
    # halving HBM bytes on the dominant gathered stream).
    x_cl = jnp.transpose(x_nchw[:, :, :, 0], (0, 2, 1)).astype(compute_dtype)

    # Neighbor gather in its natural n-major layout: rows are grouped per node, so
    # every Pallas block below is one contiguous HBM slab.  Indices are clamped to
    # [0, N) to mirror the (silently clamping) XLA gather semantics.
    idx = jnp.clip(edge_index[0].astype(jnp.int32), 0, N - 1)        # [B, N, K]
    xj = jnp.take_along_axis(x_cl, idx.reshape(B, N * K)[..., None],
                             axis=1)                                  # [B, N*K, C_in]

    if n_pad != N:
        xj = jnp.pad(xj.reshape(B, N, K, C_in),
                     ((0, 0), (0, n_pad - N), (0, 0), (0, 0))
                     ).reshape(B, n_pad * K, C_in)
        x_cl = jnp.pad(x_cl, ((0, 0), (0, n_pad - N), (0, 0)))

    # Parameters: nn2 weights pre-transposed for the lane-dense (channels-first)
    # output; biases stay f32 (applied on the VPU).
    w1_c = w1.astype(compute_dtype)                                   # [C_in, C_in]
    b1_r = b1.reshape(1, C_in).astype(jnp.float32)
    w2at = jnp.transpose(w2a).astype(compute_dtype)                   # [C_out, C_in]
    w2bt = jnp.transpose(w2b).astype(compute_dtype)                   # [C_out, C_in]
    b2_c = b2.reshape(C_out, 1).astype(jnp.float32)

    out = graphsage_pallas(xj, x_cl, w1_c, b1_r, w2at, w2bt, b2_c,
                           K=K, tile_n=tn, out_dtype=out_dtype)
    return out[:, :, :N, None]                                        # [B, C_out, N, 1]


def graphsage_reference(x_nchw, edge_index, w1, b1, w2a, w2b, b2):
    """Pure-JAX reference mirroring the PyTorch module (f32)."""
    B, C_in, N, _ = x_nchw.shape
    idx = edge_index[0]
    K = idx.shape[-1]
    x_cl = jnp.transpose(x_nchw[:, :, :, 0], (0, 2, 1))               # [B, N, C_in]
    xj = jnp.take_along_axis(x_cl, idx.reshape(B, N * K)[..., None], axis=1)
    xj = xj.reshape(B, N, K, C_in)                                    # [B, N, K, C_in]
    h = jnp.maximum(jnp.einsum('bnkc,cd->bnkd', xj, w1) + b1[0], 0.0)
    h_max = jnp.max(h, axis=2)                                        # [B, N, C_in]
    out = jnp.maximum(x_cl @ w2a + h_max @ w2b + b2[0], 0.0)          # [B, N, C_out]
    return jnp.transpose(out, (0, 2, 1))[..., None]


if __name__ == "__main__":
    def make_inputs(B, C_in, C_out, N, K, key):
        kx, ke, k1, k2, k3, k4, k5 = jax.random.split(key, 7)
        x = jax.random.normal(kx, (B, C_in, N, 1), dtype=jnp.float32)
        edge_index = jax.random.randint(ke, (2, B, N, K), 0, N, dtype=jnp.int32)
        w1 = 0.1 * jax.random.normal(k1, (C_in, C_in), dtype=jnp.float32)
        b1 = 0.1 * jax.random.normal(k2, (1, C_in), dtype=jnp.float32)
        w2a = 0.1 * jax.random.normal(k3, (C_in, C_out), dtype=jnp.float32)
        w2b = 0.1 * jax.random.normal(k4, (C_in, C_out), dtype=jnp.float32)
        b2 = 0.1 * jax.random.normal(k5, (1, C_out), dtype=jnp.float32)
        return x, edge_index, (w1, b1, w2a, w2b, b2)

    key = jax.random.PRNGKey(0)
    k_a, k_b = jax.random.split(key)

    # Small shape: exact-semantics (f32) check + default bf16 fast path.
    B, C_in, C_out, N, K = 2, 16, 32, 16, 8
    x, ei, params = make_inputs(B, C_in, C_out, N, K, k_a)
    ref = graphsage_reference(x, ei, *params)

    out_f32 = jax.block_until_ready(
        graphsage_forward(x, ei, *params, compute_dtype=jnp.float32))
    assert out_f32.shape == (B, C_out, N, 1)
    assert jnp.allclose(out_f32, ref, rtol=1e-5, atol=1e-5), "f32 mismatch vs reference"

    out_bf16 = jax.block_until_ready(graphsage_forward(x, ei, *params))
    assert out_bf16.shape == (B, C_out, N, 1)
    assert jnp.allclose(out_bf16, ref, rtol=3e-2, atol=3e-2), "bf16 mismatch vs reference"

    # Optional bf16 writeback (halves the output HBM stream).
    out_bf16_o = jax.block_until_ready(
        graphsage_forward(x, ei, *params, out_dtype=jnp.bfloat16))
    assert out_bf16_o.dtype == jnp.bfloat16
    assert jnp.allclose(out_bf16_o.astype(jnp.float32), ref, rtol=5e-2, atol=5e-2), \
        "bf16-output mismatch vs reference"

    # Larger N: exercises the padded, multi-tile N grid axis (N=384, tile_n=256 ->
    # padded to 512, 2 tiles per batch).
    N2 = 384
    x2, ei2, params2 = make_inputs(B, C_in, C_out, N2, K, k_b)
    ref2 = graphsage_reference(x2, ei2, *params2)
    out2 = jax.block_until_ready(graphsage_forward(x2, ei2, *params2, tile_n=256))
    assert out2.shape == (B, C_out, N2, 1)
    assert jnp.allclose(out2, ref2, rtol=3e-2, atol=3e-2), "tiled bf16 mismatch vs reference"

    print("KERNEL_OK")
</pallas_src>

<mosaic_0001>
module attributes {stable_mosaic.version = 11 : i64} {
  func.func @_graphsage_kernel(%arg0: i32, %arg1: i32, %arg2: memref<1x128x16xf32, #tpu.memory_space<vmem>>, %arg3: memref<1x16x16xf32, #tpu.memory_space<vmem>>, %arg4: memref<16x16xf32, #tpu.memory_space<vmem>>, %arg5: memref<1x16xf32, #tpu.memory_space<vmem>>, %arg6: memref<32x16xf32, #tpu.memory_space<vmem>>, %arg7: memref<32x16xf32, #tpu.memory_space<vmem>>, %arg8: memref<32x1xf32, #tpu.memory_space<vmem>>, %arg9: memref<1x32x16xf32, #tpu.memory_space<vmem>>) attributes {dimension_semantics = [#tpu.dimension_semantics<parallel>, #tpu.dimension_semantics<parallel>], iteration_bounds = array<i64: 2, 1>, scalar_prefetch = 0 : i64, scratch_operands = 0 : i64, tpu.core_type = #tpu.core_type<tc>, window_params = [{transform_indices = @transform_0, window_bounds = array<i64: 1, 128, 16>}, {transform_indices = @transform_1, window_bounds = array<i64: 1, 16, 16>}, {pipeline_mode = #tpu.pipeline_mode<synchronous>, transform_indices = @transform_2, window_bounds = array<i64: 16, 16>}, {pipeline_mode = #tpu.pipeline_mode<synchronous>, transform_indices = @transform_3, window_bounds = array<i64: 1, 16>}, {pipeline_mode = #tpu.pipeline_mode<synchronous>, transform_indices = @transform_4, window_bounds = array<i64: 32, 16>}, {pipeline_mode = #tpu.pipeline_mode<synchronous>, transform_indices = @transform_5, window_bounds = array<i64: 32, 16>}, {pipeline_mode = #tpu.pipeline_mode<synchronous>, transform_indices = @transform_6, window_bounds = array<i64: 32, 1>}, {transform_indices = @transform_7, window_bounds = array<i64: 1, 32, 16>}]} {
    %c0 = arith.constant 0 : index
    %c0_0 = arith.constant 0 : index
    %c0_1 = arith.constant 0 : index
    %0 = vector.load %arg2[%c0, %c0_0, %c0_1] : memref<1x128x16xf32, #tpu.memory_space<vmem>>, vector<1x128x16xf32>
    %1 = vector.shape_cast %0 : vector<1x128x16xf32> to vector<128x16xf32>
    %c0_2 = arith.constant 0 : index
    %c0_3 = arith.constant 0 : index
    %2 = vector.load %arg4[%c0_2, %c0_3] : memref<16x16xf32, #tpu.memory_space<vmem>>, vector<16x16xf32>
    %cst = arith.constant dense<0.000000e+00> : vector<128x16xf32>
    %3 = tpu.matmul %1, %2, %cst {dimension_numbers = #tpu.dot_dimension_numbers<[1], [0], [0], [1], [0, 0, 1, 1], [], []>} : vector<128x16xf32>, vector<16x16xf32>, vector<128x16xf32> -> vector<128x16xf32>
    %4 = vector.shape_cast %3 : vector<128x16xf32> to vector<16x8x16xf32>
    %cst_4 = arith.constant dense<0xFF800000> : vector<16x16xf32>
    %5 = vector.multi_reduction <maximumf>, %4, %cst_4 [1] : vector<16x8x16xf32> to vector<16x16xf32>
    %c0_5 = arith.constant 0 : index
    %c0_6 = arith.constant 0 : index
    %6 = vector.load %arg5[%c0_5, %c0_6] : memref<1x16xf32, #tpu.memory_space<vmem>>, vector<1x16xf32>
    %7 = vector.broadcast %6 : vector<1x16xf32> to vector<16x16xf32>
    %8 = arith.addf %5, %7 : vector<16x16xf32>
    %cst_7 = arith.constant 0.000000e+00 : f32
    %9 = vector.broadcast %cst_7 : f32 to vector<16x16xf32>
    %10 = arith.maximumf %8, %9 : vector<16x16xf32>
    %c0_8 = arith.constant 0 : index
    %c0_9 = arith.constant 0 : index
    %11 = vector.load %arg6[%c0_8, %c0_9] : memref<32x16xf32, #tpu.memory_space<vmem>>, vector<32x16xf32>
    %c0_10 = arith.constant 0 : index
    %c0_11 = arith.constant 0 : index
    %c0_12 = arith.constant 0 : index
    %12 = vector.load %arg3[%c0_10, %c0_11, %c0_12] : memref<1x16x16xf32, #tpu.memory_space<vmem>>, vector<1x16x16xf32>
    %13 = vector.shape_cast %12 : vector<1x16x16xf32> to vector<16x16xf32>
    %cst_13 = arith.constant dense<0.000000e+00> : vector<32x16xf32>
    %14 = tpu.matmul %11, %13, %cst_13 {dimension_numbers = #tpu.dot_dimension_numbers<[1], [1], [0], [0], [0, 0, 1, 0], [], []>} : vector<32x16xf32>, vector<16x16xf32>, vector<32x16xf32> -> vector<32x16xf32>
    %c0_14 = arith.constant 0 : index
    %c0_15 = arith.constant 0 : index
    %15 = vector.load %arg7[%c0_14, %c0_15] : memref<32x16xf32, #tpu.memory_space<vmem>>, vector<32x16xf32>
    %cst_16 = arith.constant dense<0.000000e+00> : vector<32x16xf32>
    %16 = tpu.matmul %15, %10, %cst_16 {dimension_numbers = #tpu.dot_dimension_numbers<[1], [1], [0], [0], [0, 0, 1, 0], [], []>} : vector<32x16xf32>, vector<16x16xf32>, vector<32x16xf32> -> vector<32x16xf32>
    %17 = arith.addf %14, %16 : vector<32x16xf32>
    %c0_17 = arith.constant 0 : index
    %c0_18 = arith.constant 0 : index
    %18 = vector.load %arg8[%c0_17, %c0_18] : memref<32x1xf32, #tpu.memory_space<vmem>>, vector<32x1xf32>
    %19 = vector.broadcast %18 : vector<32x1xf32> to vector<32x16xf32>
    %20 = arith.addf %17, %19 : vector<32x16xf32>
    %cst_19 = arith.constant 0.000000e+00 : f32
    %21 = vector.broadcast %cst_19 : f32 to vector<32x16xf32>
    %22 = arith.maximumf %20, %21 : vector<32x16xf32>
    %c0_20 = arith.constant 0 : index
    %c0_21 = arith.constant 0 : index
    %c0_22 = arith.constant 0 : index
    %23 = vector.load %arg9[%c0_20, %c0_21, %c0_22] : memref<1x32x16xf32, #tpu.memory_space<vmem>>, vector<1x32x16xf32>
    %24 = vector.shape_cast %23 : vector<1x32x16xf32> to vector<32x16xf32>
    %25 = vector.shape_cast %22 : vector<32x16xf32> to vector<1x32x16xf32>
    tpu.vector_store %arg9[%c0_20, %c0_21, %c0_22], %25 {strides = array<i32>} : memref<1x32x16xf32, #tpu.memory_space<vmem>>, vector<1x32x16xf32>,
    return
  }
  func.func @transform_0(%arg0: i32, %arg1: i32) -> (i32, i32, i32) {
    %c0_i32 = arith.constant 0 : i32
    %c0_i32_0 = arith.constant 0 : i32
    return %arg0, %arg1, %c0_i32 : i32, i32, i32
  }
  func.func @transform_1(%arg0: i32, %arg1: i32) -> (i32, i32, i32) {
    %c0_i32 = arith.constant 0 : i32
    %c0_i32_0 = arith.constant 0 : i32
    return %arg0, %arg1, %c0_i32 : i32, i32, i32
  }
  func.func @transform_2(%arg0: i32, %arg1: i32) -> (i32, i32) {
    %c0_i32 = arith.constant 0 : i32
    %c0_i32_0 = arith.constant 0 : i32
    %c0_i32_1 = arith.constant 0 : i32
    return %c0_i32, %c0_i32_0 : i32, i32
  }
  func.func @transform_3(%arg0: i32, %arg1: i32) -> (i32, i32) {
    %c0_i32 = arith.constant 0 : i32
    %c0_i32_0 = arith.constant 0 : i32
    %c0_i32_1 = arith.constant 0 : i32
    return %c0_i32, %c0_i32_0 : i32, i32
  }
  func.func @transform_4(%arg0: i32, %arg1: i32) -> (i32, i32) {
    %c0_i32 = arith.constant 0 : i32
    %c0_i32_0 = arith.constant 0 : i32
    %c0_i32_1 = arith.constant 0 : i32
    return %c0_i32, %c0_i32_0 : i32, i32
  }
  func.func @transform_5(%arg0: i32, %arg1: i32) -> (i32, i32) {
    %c0_i32 = arith.constant 0 : i32
    %c0_i32_0 = arith.constant 0 : i32
    %c0_i32_1 = arith.constant 0 : i32
    return %c0_i32, %c0_i32_0 : i32, i32
  }
  func.func @transform_6(%arg0: i32, %arg1: i32) -> (i32, i32) {
    %c0_i32 = arith.constant 0 : i32
    %c0_i32_0 = arith.constant 0 : i32
    %c0_i32_1 = arith.constant 0 : i32
    return %c0_i32, %c0_i32_0 : i32, i32
  }
  func.func @transform_7(%arg0: i32, %arg1: i32) -> (i32, i32, i32) {
    %c0_i32 = arith.constant 0 : i32
    %c0_i32_0 = arith.constant 0 : i32
    return %arg0, %c0_i32, %arg1 : i32, i32, i32
  }
}

</mosaic_0001>

<bundles_post_ra>
// kernel: tpu_custom_call.1
= control target key start
LH: loop header
LB: loop body
LE: loop exit
PB: predicated region body
PF: predicated region fallthrough
CT: control target
= control target key end

     0   :  { %s1064_s24 = smov 0   ;;  %s1066_s25 = smov 0   ;;  %s1232_s0 = inlined_call_operand.vmem [shape: f32[2,128,16], index: 0, kind: input, shape index: {}]   ;;  %s1233_s1 = inlined_call_operand.vmem [shape: f32[2,16,16], index: 1, kind: input, shape index: {}]   ;;  %s1234_s2 = inlined_call_operand.vmem [shape: f32[16,16], index: 2, kind: input, shape index: {}]   ;;  %s1235_s3 = inlined_call_operand.vmem [shape: f32[1,16], index: 3, kind: input, shape index: {}]   ;;  %s1236_s4 = inlined_call_operand.vmem [shape: f32[32,16], index: 4, kind: input, shape index: {}]   ;;  %s1237_s5 = inlined_call_operand.vmem [shape: f32[32,16], index: 5, kind: input, shape index: {}]   ;;  %s1238_s6 = inlined_call_operand.vmem [shape: f32[32,1], index: 6, kind: input, shape index: {}]   ;;  %s1239_s7 = inlined_call_operand.vmem [shape: f32[2,32,16], index: 7, kind: output, shape index: {}]  }
   0x1   :  { %s1068_s26 = smov 0  }
   0x2 LB: > { %s29_s27 = sadd.s32 1, %s1017_s25  ;;  %p925_p0 = scmp.ge.s32.totalorder %s1021_s26, 1  ;;  %s1021_s26 = sphi %s1068_s26, %s17_s26   ;;  %s1017_s25 = sphi %s1066_s25, %s1241_s25   ;;  %s1013_s24 = sphi %s1064_s24, %s1240_s24  }
   0x3   : > { %p31_p1 = scmp.ge.s32.totalorder %s29_s27, 2  ;;  %p275_p2 = scmp.lt.s32.totalorder %s1021_s26, 3 }
   0x5   : > { %s1243_s27 = smov (%p31_p1, %s29_s27), 0  ;;  %p276_p3 = pnand %p925_p0, %p275_p2 }
   0x6   : > { %p324_p4 = scmp.lt.s32.totalorder (!%p276_p3), %s1013_s24, 1 }
   0x7   : > { %279 = sbr.rel (%p276_p3) target bundleno = 374 (0x176), region = 48 }
   0xc   : > { %v368_v0 = vld [vmem:[%s1234_s2 + $0x8] sm:$0xff]  ;;  %v367_v1 = vld [vmem:[%s1234_s2] sm:$0xff]  ;;  %s1245_s24 = smov (!%p324_p4, %s1013_s24), 1  ;;  %vm369_vm0 = vcmask 130048   ;;  %vm658_vm1 = vcmask 1041409   ;;  %vm661_vm2 = vcmask 1042434  }
   0xd   : > { %432 = vmatpush.msra.mxu0 %v368_v0  ;;  %966 = vmatpush.msra.mxu2 %v368_v0  ;;  %s962_s9 = sshll.u32 %s1245_s24, 7  ;;  %s963_s13 = sshll.u32 %s1245_s24, 4  ;;  %vm664_vm3 = vcmask 1043459   ;;  %vm667_vm4 = vcmask 1044484   ;;  %vm670_vm5 = vcmask 1045509   ;;  %vm673_vm6 = vcmask 1046534  }
   0xe   : > { %967 = vmatpush.msra.mxu3 %v368_v0  ;;  %965 = vmatpush.msra.mxu1 %v368_v0  ;;  %s331_s12 = scalar_lea.vmem %s1232_s0, %s962_s9  ;;  %s341_s16 = scalar_lea.vmem %s1233_s1, %s963_s13  ;;  %vm676_vm7 = vcmask 1047559  }
   0xf   : > { %433 = vmatpush.msra.mxu0 %v367_v1  ;;  %969 = vmatpush.msra.mxu2 %v367_v1  ;;  %v351_v2 = vld [vmem:[%s331_s12] sm:$0xff]  ;;  %v361_v4 = vld [vmem:[%s331_s12 + $0x50] sm:$0xff]  ;;  %v352_v6 = vld [vmem:[%s331_s12 + $0x8] sm:$0xff]  ;;  %s964_s28 = sshll.u32 %s1245_s24, 5 }
  0x10   : > { %970 = vmatpush.msra.mxu3 %v367_v1  ;;  %968 = vmatpush.msra.mxu1 %v367_v1  ;;  %v359_v3 = vld [vmem:[%s331_s12 + $0x40] sm:$0xff]  ;;  %v357_v5 = vld [vmem:[%s331_s12 + $0x30] sm:$0xff]  ;;  %v360_v7 = vld [vmem:[%s331_s12 + $0x48] sm:$0xff]  ;;  %s350_s8 = scalar_lea.vmem %s1239_s7, %s964_s28 }
  0x11   : > { %932 = vmatmul.msk.f32.vlgmr.msra.gmra.mxu0 %vm369_vm0, %v351_v2  ;;  %940 = vmatmul.msk.f32.vlgmr.msra.gmra.mxu2 %vm369_vm0, %v359_v3  ;;  %v362_v8 = vld [vmem:[%s331_s12 + $0x58] sm:$0xff]  ;;  %v353_v10 = vld [vmem:[%s331_s12 + $0x10] sm:$0xff]  ;;  %v363_v11 = vld [vmem:[%s331_s12 + $0x60] sm:$0xff] }
  0x12   : > { %942 = vmatmul.msk.f32.vlgmr.msra.gmra.mxu3 %vm369_vm0, %v361_v4  ;;  %938 = vmatmul.msk.f32.vlgmr.msra.gmra.mxu1 %vm369_vm0, %v357_v5  ;;  %v358_v9 = vld [vmem:[%s331_s12 + $0x38] sm:$0xff]  ;;  %v364_v13 = vld [vmem:[%s331_s12 + $0x68] sm:$0xff]  ;;  %v355_v14 = vld [vmem:[%s331_s12 + $0x20] sm:$0xff] }
  0x13   : > { %v354_v12 = vld [vmem:[%s331_s12 + $0x18] sm:$0xff]  ;;  %v365_v15 = vld [vmem:[%s331_s12 + $0x70] sm:$0xff]  ;;  %v356_v16 = vld [vmem:[%s331_s12 + $0x28] sm:$0xff] }
  0x14   : > { %v366_v17 = vld [vmem:[%s331_s12 + $0x78] sm:$0xff]  ;;  %v636_v56 = vld [vmem:[%s341_s16 + $0x8] sm:$0xff]  ;;  %v635_v62 = vld [vmem:[%s341_s16] sm:$0xff] }
  0x15   : > { %954 = vmatpush.xpose.msk.msrb.mxu2 %vm369_vm0, %v636_v56 }
  0x19   : > { %933 = vmatmul.msk.f32.gmra.mxu0 %vm369_vm0, %v352_v6  ;;  %941 = vmatmul.msk.f32.gmra.mxu2 %vm369_vm0, %v360_v7 }
  0x1a   : > { %943 = vmatmul.msk.f32.gmra.mxu3 %vm369_vm0, %v362_v8  ;;  %939 = vmatmul.msk.f32.gmra.mxu1 %vm369_vm0, %v358_v9 }
  0x1b   : > { %955 = vmatpush.xpose.msk.msrb.mxu2 %vm369_vm0, %v635_v62 }
  0x21   : > { %934 = vmatmul.msk.f32.gmra.mxu0 %vm369_vm0, %v353_v10 }
  0x22   : > { %944 = vmatmul.msk.f32.gmra.mxu3 %vm369_vm0, %v363_v11  ;;  %v1131_v11 = vld [vmem:[%s1235_s3] ss:$0 sm:$0xff] }
  0x29   : > { %935 = vmatmul.msk.f32.gmra.mxu0 %vm369_vm0, %v354_v12 }
  0x2a   : > { %945 = vmatmul.msk.f32.gmra.mxu3 %vm369_vm0, %v364_v13 }
  0x31   : > { %936 = vmatmul.msk.f32.gmra.mxu0 %vm369_vm0, %v355_v14 }
  0x32   : > { %946 = vmatmul.msk.f32.gmra.mxu3 %vm369_vm0, %v365_v15 }
  0x39   : > { %937 = vmatmul.msk.f32.gmra.mxu0 %vm369_vm0, %v356_v16 }
  0x3a   : > { %947 = vmatmul.msk.f32.gmra.mxu3 %vm369_vm0, %v366_v17 }
  0x8e   : > { %v435_v18 = vpop.f32.mrf.mxu0 }
  0x8f   : > { %v483_v21 = vsel %vm369_vm0, %v435_v18, -inf  ;;  %v453_v29 = vpop.f32.mrf.mxu1 }
  0x90   : > { %v484_v23 = vrot.slane %v483_v21, 4  ;;  %v525_v31 = vsel %vm369_vm0, %v453_v29, -inf }
  0x91   : > { %v526_v37 = vrot.slane %v525_v31, 4 }
  0x92   : > { %v485_v24 = vmax.f32 %v483_v21, %v484_v23 }
  0x93   : > { %v527_v49 = vmax.f32 %v525_v31, %v526_v37 }
  0x94   : > { %v459_v19 = vpop.f32.mrf.mxu2  ;;  %v486_v32 = vrot.slane %v485_v24, 2 }
  0x95   : > { %v465_v20 = vpop.f32.mrf.mxu3  ;;  %v539_v28 = vsel %vm369_vm0, %v459_v19, -inf  ;;  %v528_v60 = vrot.slane %v527_v49, 2 }
  0x96   : > { %v438_v22 = vpop.f32.mrf.mxu0  ;;  %v553_v33 = vsel %vm369_vm0, %v465_v20, -inf  ;;  %v540_v35 = vrot.slane %v539_v28, 4  ;;  %v487_v40 = vmax.f32 %v485_v24, %v486_v32 }
  0x97   : > { %v490_v34 = vsel %vm369_vm0, %v438_v22, -inf  ;;  %v554_v38 = vrot.slane %v553_v33, 4  ;;  %v456_v61 = vpop.f32.mrf.mxu1  ;;  %v529_v15 = vmax.f32 %v527_v49, %v528_v60 }
  0x98   : > { %v491_v39 = vrot.slane %v490_v34, 4  ;;  %v541_v43 = vmax.f32 %v539_v28, %v540_v35  ;;  %v488_v53 = vrot.slane %v487_v40, 1  ;;  %v532_v10 = vsel %vm369_vm0, %v456_v61, -inf }
  0x99   : > { %v555_v50 = vmax.f32 %v553_v33, %v554_v38  ;;  %v533_v23 = vrot.slane %v532_v10, 4  ;;  %v530_v37 = vrot.slane %v529_v15, 1 }
  0x9a   : > { %v492_v51 = vmax.f32 %v490_v34, %v491_v39  ;;  %v542_v57 = vrot.slane %v541_v43, 2  ;;  %v489_v2 = vmax.f32 %v487_v40, %v488_v53 }
  0x9b   : > { %v556_v63 = vrot.slane %v555_v50, 2  ;;  %v534_v39 = vmax.f32 %v532_v10, %v533_v23  ;;  %v531_v60 = vmax.f32 %v529_v15, %v530_v37 }
  0x9c   : > { %v462_v25 = vpop.f32.mrf.mxu2  ;;  %v493_v0 = vrot.slane %v492_v51, 2  ;;  %v543_v6 = vmax.f32 %v541_v43, %v542_v57  ;;  %v1138_v28 = vadd.f32 %v1131_v11, %v489_v2  ;;  %v632_v57 = vld [vmem:[%s1236_s4 + $0x8] sm:$0xff] }
  0x9d   : > { %v468_v26 = vpop.f32.mrf.mxu3  ;;  %v546_v30 = vsel %vm369_vm0, %v462_v25, -inf  ;;  %v557_v16 = vmax.f32 %v555_v50, %v556_v63  ;;  %v535_v56 = vrot.slane %v534_v39, 2 }
  0x9e   : > { %v441_v27 = vpop.f32.mrf.mxu0  ;;  %v547_v36 = vrot.slane %v546_v30, 4  ;;  %v560_v44 = vsel %vm369_vm0, %v468_v26, -inf  ;;  %v494_v17 = vmax.f32 %v492_v51, %v493_v0  ;;  %v544_v24 = vrot.slane %v543_v6, 1 }
  0x9f   : > { %v497_v41 = vsel %vm369_vm0, %v441_v27, -inf  ;;  %v561_v54 = vrot.slane %v560_v44, 4  ;;  %v631_v27 = vld [vmem:[%s1236_s4] sm:$0xff]  ;;  %v558_v31 = vrot.slane %v557_v16, 1 }
  0xa0   : > { %v548_v46 = vmax.f32 %v546_v30, %v547_v36  ;;  %v498_v52 = vrot.slane %v497_v41, 4  ;;  %956 = vmatmul.msk.f32.vlgmr.msrb.gmra.mxu2 %vm369_vm0, %v631_v27  ;;  %v495_v32 = vrot.slane %v494_v17, 1  ;;  %v545_v40 = vmax.f32 %v543_v6, %v544_v24 }
  0xa1   : > { %v562_v3 = vmax.f32 %v560_v44, %v561_v54  ;;  %v559_v49 = vmax.f32 %v557_v16, %v558_v31 }
  0xa2   : > { %v549_v59 = vrot.slane %v548_v46, 2  ;;  %v499_v1 = vmax.f32 %v497_v41, %v498_v52  ;;  %v496_v50 = vmax.f32 %v494_v17, %v495_v32  ;;  %v607_v62 = vadd.f32 %v1131_v11, %v545_v40 }
  0xa3   : > { %v563_v20 = vrot.slane %v562_v3, 2  ;;  %v609_v2 = vadd.f32 %v1131_v11, %v559_v49  ;;  %v1023_v49 = vmov 0  }
  0xa4   : > { %v550_v12 = vmax.f32 %v548_v46, %v549_v59  ;;  %v500_v18 = vrot.slane %v499_v1, 2  ;;  %996 = vset.pattern.permute.xlu0 %v1023_v49  ;;  %997 = vset.pattern.permute.xlu1 %v1023_v49 }
  0xa5   : > { %v471_v42 = vpop.f32.mrf.mxu3  ;;  %v564_v35 = vmax.f32 %v562_v3, %v563_v20  ;;  %v600_v3 = vadd.f32 %v1131_v11, %v496_v50  ;;  %v784_v50 = vld [vmem:[%s1238_s6] sm:$0xff] }
  0xa6   : > { %v444_v45 = vpop.f32.mrf.mxu0  ;;  %v567_v47 = vsel %vm369_vm0, %v471_v42, -inf  ;;  %v551_v29 = vrot.slane %v550_v12, 1  ;;  %v501_v33 = vmax.f32 %v499_v1, %v500_v18  ;;  %790 = vperm.xlu0 %996, %v784_v50  }
  0xa7   : > { %v504_v48 = vsel %vm369_vm0, %v444_v45, -inf  ;;  %v568_v58 = vrot.slane %v567_v47, 4  ;;  %v565_v53 = vrot.slane %v564_v35, 1  ;;  %v616_v20 = vmax.f32 %v600_v3, 0.0 }
  0xa8   : > { %v505_v55 = vrot.slane %v504_v48, 4  ;;  %v552_v45 = vmax.f32 %v550_v12, %v551_v29  ;;  %v502_v51 = vrot.slane %v501_v33, 1  ;;  %957 = vmatmul.msk.f32.gmra.mxu2 %vm369_vm0, %v632_v57  ;;  %v633_v29 = vld [vmem:[%s1236_s4 + $0x10] sm:$0xff] }
  0xa9   : > { %v569_v7 = vmax.f32 %v567_v47, %v568_v58  ;;  %v566_v6 = vmax.f32 %v564_v35, %v565_v53 }
  0xaa   : > { %v506_v4 = vmax.f32 %v504_v48, %v505_v55  ;;  %v608_v63 = vadd.f32 %v1131_v11, %v552_v45  ;;  %v657_v45 = vrot.slane %v616_v20, 7 }
  0xab   : > { %v570_v25 = vrot.slane %v569_v7, 2 }
  0xac   : > { %v507_v21 = vrot.slane %v506_v4, 2  ;;  %v624_v16 = vmax.f32 %v608_v63, 0.0  ;;  %v634_v63 = vld [vmem:[%s1236_s4 + $0x18] sm:$0xff] }
  0xad   : > { %v474_v5 = vpop.f32.mrf.mxu3  ;;  %v571_v41 = vmax.f32 %v569_v7, %v570_v25 }
  0xae   : > { %v574_v8 = vsel %vm369_vm0, %v474_v5, -inf  ;;  %v447_v9 = vpop.f32.mrf.mxu0  ;;  %v508_v36 = vmax.f32 %v506_v4, %v507_v21  ;;  %v503_v4 = vmax.f32 %v501_v33, %v502_v51  ;;  %v678_v35 = vrot.slane %v624_v16, 7  ;;  %v785_v16 = vld [vmem:[%s1238_s6 + $0x8] sm:$0xff] }
  0xaf   : > { %v575_v13 = vrot.slane %v574_v8, 4  ;;  %v511_v14 = vsel %vm369_vm0, %v447_v9, -inf  ;;  %v572_v58 = vrot.slane %v571_v41, 1  ;;  %v536_v9 = vmax.f32 %v534_v39, %v535_v56  ;;  %795 = vperm.xlu0 %996, %v785_v16  }
  0xb0   : > { %v512_v19 = vrot.slane %v511_v14, 4  ;;  %v509_v54 = vrot.slane %v508_v36, 1  ;;  %v601_v21 = vadd.f32 %v1131_v11, %v503_v4  ;;  %958 = vmatmul.msk.f32.gmra.mxu2 %vm369_vm0, %v633_v29  ;;  %v638_v29 = vld [vmem:[%s1237_s5 + $0x8] sm:$0xff] }
  0xb1   : > { %v576_v22 = vmax.f32 %v574_v8, %v575_v13  ;;  %v573_v12 = vmax.f32 %v571_v41, %v572_v58 }
  0xb2   : > { %v513_v26 = vmax.f32 %v511_v14, %v512_v19  ;;  %v510_v7 = vmax.f32 %v508_v36, %v509_v54  ;;  %v617_v39 = vmax.f32 %v601_v21, 0.0 }
  0xb3   : > { %v577_v30 = vrot.slane %v576_v22, 2  ;;  %v611_v31 = vadd.f32 %v1131_v11, %v573_v12 }
  0xb4   : > { %v514_v34 = vrot.slane %v513_v26, 2  ;;  %v602_v24 = vadd.f32 %v1131_v11, %v510_v7  ;;  %v660_v57 = vrot.slane %v617_v39, 6 }
  0xb5   : > { %v477_v38 = vpop.f32.mrf.mxu3  ;;  %v578_v46 = vmax.f32 %v576_v22, %v577_v30  ;;  %v1154_v22 = vadd.f32 %v1131_v11, %v531_v60  ;;  %v610_v30 = vadd.f32 %v1131_v11, %v566_v6 }
  0xb6   : > { %v515_v42 = vmax.f32 %v513_v26, %v514_v34  ;;  %v581_v43 = vsel %vm369_vm0, %v477_v38, -inf  ;;  %v450_v44 = vpop.f32.mrf.mxu0  ;;  %v537_v26 = vrot.slane %v536_v9, 1  ;;  %v623_v34 = vmax.f32 %v607_v62, 0.0 }
  0xb7   : > { %v582_v47 = vrot.slane %v581_v43, 4  ;;  %v518_v48 = vsel %vm369_vm0, %v450_v44, -inf  ;;  %v579_v0 = vrot.slane %v578_v46, 1  ;;  %v625_v38 = vmax.f32 %v609_v2, 0.0 }
  0xb8   : > { %v519_v52 = vrot.slane %v518_v48, 4  ;;  %v516_v59 = vrot.slane %v515_v42, 1  ;;  %v679_v51 = vsel %vm658_vm1, %v678_v35, %v623_v34  ;;  %v621_v60 = vmax.f32 %v1154_v22, 0.0  ;;  %959 = vmatmul.msk.f32.gmra.mxu2 %vm369_vm0, %v634_v63 }
  0xb9   : > { %v583_v55 = vmax.f32 %v581_v43, %v582_v47  ;;  %v580_v17 = vmax.f32 %v578_v46, %v579_v0  ;;  %v538_v43 = vmax.f32 %v536_v9, %v537_v26  ;;  %v626_v46 = vmax.f32 %v610_v30, 0.0  ;;  %v639_v30 = vld [vmem:[%s1237_s5 + $0x10] sm:$0xff] }
  0xba   : > { %v520_v61 = vmax.f32 %v518_v48, %v519_v52  ;;  %v517_v13 = vmax.f32 %v515_v42, %v516_v59  ;;  %v618_v42 = vmax.f32 %v602_v24, 0.0  ;;  %v627_v47 = vmax.f32 %v611_v31, 0.0  ;;  %v640_v31 = vld [vmem:[%s1237_s5 + $0x18] sm:$0xff] }
  0xbb   : > { %v584_v1 = vrot.slane %v583_v55, 2  ;;  %v612_v36 = vadd.f32 %v1131_v11, %v580_v17  ;;  %v680_v56 = vrot.slane %v625_v38, 6  ;;  %v606_v62 = vadd.f32 %v1131_v11, %v538_v43 }
  0xbc   : > { %v521_v5 = vrot.slane %v520_v61, 2  ;;  %v603_v32 = vadd.f32 %v1131_v11, %v517_v13  ;;  %v663_v59 = vrot.slane %v618_v42, 5  ;;  %v672_v21 = vrot.slane %v621_v60, 2 }
  0xbd   : > { %v585_v8 = vmax.f32 %v583_v55, %v584_v1  ;;  %v480_v10 = vpop.f32.mrf.mxu3  ;;  %v628_v52 = vmax.f32 %v612_v36, 0.0  ;;  %v615_v55 = vmax.f32 %v1138_v28, 0.0  ;;  %v684_v1 = vrot.slane %v627_v47, 4 }
  0xbe   : > { %v522_v14 = vmax.f32 %v520_v61, %v521_v5  ;;  %v588_v15 = vsel %vm369_vm0, %v480_v10, -inf  ;;  %v619_v48 = vmax.f32 %v603_v32, 0.0  ;;  %v681_v3 = vsel %vm661_vm2, %v680_v56, %v679_v51 }
  0xbf   : > { %v586_v18 = vrot.slane %v585_v8, 1  ;;  %v589_v19 = vrot.slane %v588_v15, 4  ;;  %v659_v0 = vsel %vm658_vm1, %v657_v45, %v615_v55  ;;  %v682_v28 = vrot.slane %v626_v46, 5 }
  0xc0   : > { %v523_v23 = vrot.slane %v522_v14, 1  ;;  %v666_v2 = vrot.slane %v619_v48, 4  ;;  %v686_v4 = vrot.slane %v628_v52, 3  ;;  %v622_v12 = vmax.f32 %v606_v62, 0.0 }
  0xc1   : > { %v587_v25 = vmax.f32 %v585_v8, %v586_v18  ;;  %v590_v27 = vmax.f32 %v588_v15, %v589_v19  ;;  %v662_v8 = vsel %vm661_vm2, %v660_v57, %v659_v0  ;;  %v683_v10 = vsel %vm664_vm3, %v682_v28, %v681_v3 }
  0xc2   : > { %v524_v33 = vmax.f32 %v522_v14, %v523_v23  ;;  %v665_v13 = vsel %vm664_vm3, %v663_v59, %v662_v8  ;;  %v685_v14 = vsel %vm667_vm4, %v684_v1, %v683_v10  ;;  %v675_v23 = vrot.slane %v622_v12, 1 }
  0xc3   : > { %v591_v37 = vrot.slane %v590_v27, 2  ;;  %v613_v40 = vadd.f32 %v1131_v11, %v587_v25  ;;  %v668_v15 = vsel %vm667_vm4, %v666_v2, %v665_v13  ;;  %v687_v17 = vsel %vm670_vm5, %v686_v4, %v685_v14  ;;  %v787_v25 = vld [vmem:[%s1238_s6 + $0x18] sm:$0xff] }
  0xc4   : > { %v604_v41 = vadd.f32 %v1131_v11, %v524_v33 }
  0xc5   : > { %v592_v44 = vmax.f32 %v590_v27, %v591_v37  ;;  %v629_v58 = vmax.f32 %v613_v40, 0.0  ;;  %v637_v27 = vld [vmem:[%s1237_s5] sm:$0xff] }
  0xc6   : > { %v620_v53 = vmax.f32 %v604_v41, 0.0 }
  0xc7   : > { %v593_v54 = vrot.slane %v592_v44, 1  ;;  %v688_v7 = vrot.slane %v629_v58, 2 }
  0xc8   : > { %v669_v5 = vrot.slane %v620_v53, 3 }
  0xc9   : > { %v594_v61 = vmax.f32 %v592_v44, %v593_v54  ;;  %v689_v20 = vsel %vm673_vm6, %v688_v7, %v687_v17 }
  0xca   : > { %v671_v19 = vsel %vm670_vm5, %v669_v5, %v668_v15 }
  0xcb   : > { %v614_v6 = vadd.f32 %v1131_v11, %v594_v61  ;;  %v786_v11 = vld [vmem:[%s1238_s6 + $0x10] sm:$0xff]  ;;  %v674_v24 = vsel %vm673_vm6, %v672_v21, %v671_v19 }
  0xcc   : > { %800 = vperm.xlu1 %997, %v786_v11   ;;  %v677_v26 = vsel %vm676_vm7, %v675_v23, %v674_v24 }
  0xcd   : > { %v630_v9 = vmax.f32 %v614_v6, 0.0 }
  0xcf   : > { %v690_v18 = vrot.slane %v630_v9, 1 }
  0xd1   : > { %v691_v22 = vsel %vm676_vm7, %v690_v18, %v689_v20 }
  0xd2   : > { %948 = vmatpush.xpose.msk.msrb.mxu1 %vm369_vm0, %v691_v22 }
  0xd4   : > { %805 = vperm.xlu1 %997, %v787_v25  }
  0xd6   : > { %949 = vmatpush.xpose.msk.msrb.mxu1 %vm369_vm0, %v677_v26 }
  0xd9   : > { %950 = vmatmul.msk.f32.vlgmr.msrb.gmra.mxu1 %vm369_vm0, %v637_v27 }
  0xe1   : > { %951 = vmatmul.msk.f32.gmra.mxu1 %vm369_vm0, %v638_v29 }
  0xe9   : > { %952 = vmatmul.msk.f32.gmra.mxu1 %vm369_vm0, %v639_v30 }
  0xf1   : > { %953 = vmatmul.msk.f32.gmra.mxu1 %vm369_vm0, %v640_v31 }
 0x118   : > { %v791_v33 = vpop.permute.xlu0 %790 }
 0x121   : > { %v796_v40 = vpop.permute.xlu0 %795 }
 0x123   : > { %v772_v32 = vpop.f32.mrf.mxu2 }
 0x12b   : > { %v775_v36 = vpop.f32.mrf.mxu2 }
 0x133   : > { %v778_v43 = vpop.f32.mrf.mxu2 }
 0x13b   : > { %v781_v50 = vpop.f32.mrf.mxu2 }
 0x13e   : > { %v801_v46 = vpop.permute.xlu1 %800 }
 0x146   : > { %v806_v53 = vpop.permute.xlu1 %805 }
 0x156   : > { %v725_v34 = vpop.f32.mrf.mxu1 }
 0x157   : > { %v773_v35 = vadd.f32 %v772_v32, %v725_v34 }
 0x159   : > { %v808_v37 = vadd.f32 %v791_v33, %v773_v35 }
 0x15b   : > { %v812_v38 = vmax.f32 %v808_v37, 0.0 }
 0x15d   : > { %816 = vst.msk [vmem:[%s350_s8] sm:$0xff] %vm369_vm0, %v812_v38 }
 0x15e   : > { %v728_v39 = vpop.f32.mrf.mxu1 }
 0x15f   : > { %v776_v41 = vadd.f32 %v775_v36, %v728_v39 }
 0x161   : > { %v809_v42 = vadd.f32 %v796_v40, %v776_v41 }
 0x163   : > { %v813_v44 = vmax.f32 %v809_v42, 0.0 }
 0x165   : > { %817 = vst.msk [vmem:[%s350_s8 + $0x8] sm:$0xff] %vm369_vm0, %v813_v44 }
 0x166   : > { %v731_v45 = vpop.f32.mrf.mxu1 }
 0x167   : > { %v779_v47 = vadd.f32 %v778_v43, %v731_v45 }
 0x169   : > { %v810_v48 = vadd.f32 %v801_v46, %v779_v47 }
 0x16b   : > { %v814_v49 = vmax.f32 %v810_v48, 0.0 }
 0x16d   : > { %818 = vst.msk [vmem:[%s350_s8 + $0x10] sm:$0xff] %vm369_vm0, %v814_v49 }
 0x16e   : > { %v734_v51 = vpop.f32.mrf.mxu1 }
 0x16f   : > { %v782_v52 = vadd.f32 %v781_v50, %v734_v51 }
 0x171   : > { %v811_v54 = vadd.f32 %v806_v53, %v782_v52 }
 0x173   : > { %v815_v55 = vmax.f32 %v811_v54, 0.0 }
 0x175   : > { %819 = vst.msk [vmem:[%s350_s8 + $0x18] sm:$0xff] %vm369_vm0, %v815_v55 }
 0x176 PF: > { %s17_s26 = sadd.s32 1, %s1021_s26   ;;  %s1240_s24 = smov %s1017_s25 }
 0x177   : > { %p14_p5 = scmp.ge.s32.totalorder %s17_s26, 4   ;;  %s1241_s25 = smov %s1243_s27 }
 0x179   :  { %16 = sbr.rel (!%p14_p5) target bundleno = 2 (0x2), region = 81 }

</bundles_post_ra>
